<compile_context>
chip_gen: v5e
topology: v5e:2x2
jax: 0.10.0
libtpu: 0.0.40
codegen_flags: <defaults>
</compile_context>

<pallas_src>
import jax
import jax.numpy as jnp
from jax.experimental import pallas as pl
from jax.experimental.pallas import tpu as pltpu


def _alpha_threshold_kernel(init_ref, max_ref, out_ref):
    # init_ref, max_ref: (1,)-shaped f32 refs in SMEM (free scalar-slot reads,
    # no input DMA, no recompile per max_value).
    # Broadcast the scalar into a tiny vreg tile so tanh lowers to the EUP,
    # scale by the SMEM scalar (scalar*vector broadcast), store (1,1) result.
    x = jnp.full((1, 1), init_ref[0], dtype=jnp.float32)
    out_ref[...] = jnp.tanh(x) * max_ref[0]


@jax.custom_vjp
def _alpha_threshold_core(init1: jax.Array, max0: jax.Array) -> jax.Array:
    # init1: (1,) f32, max0: () f32. Returns (1,) f32.
    out2d = pl.pallas_call(
        _alpha_threshold_kernel,
        out_shape=jax.ShapeDtypeStruct((1, 1), jnp.float32),
        in_specs=[
            pl.BlockSpec(memory_space=pltpu.MemorySpace.SMEM),  # init scalar
            pl.BlockSpec(memory_space=pltpu.MemorySpace.SMEM),  # max_value scalar
        ],
        out_specs=pl.BlockSpec(memory_space=pltpu.MemorySpace.VMEM),
    )(init1, max0.reshape(1))
    return out2d.reshape(1)


def _alpha_threshold_core_fwd(init1, max0):
    return _alpha_threshold_core(init1, max0), None


def _alpha_threshold_core_bwd(_, g):
    # PushToInfFunction.backward: returns -ones_like(grad_output), i.e. the
    # gradient wrt `init` is -1 irrespective of the upstream cotangent.
    # max_value is a plain Python float in the PyTorch module (not a
    # Parameter), so its cotangent is zero.
    d_init = -jnp.ones((1,), dtype=jnp.float32)
    d_max = jnp.zeros((), dtype=jnp.float32)
    return d_init, d_max


_alpha_threshold_core.defvjp(_alpha_threshold_core_fwd, _alpha_threshold_core_bwd)


@jax.jit
def alpha_threshold_forward(init_param: jax.Array, max_value) -> jax.Array:
    """init_param: (1,)-shaped f32 parameter; max_value: Python float or scalar.

    Returns tanh(init_param) * max_value with shape (1,) f32.
    """
    init1 = jnp.asarray(init_param, dtype=jnp.float32).reshape(1)
    max0 = jnp.asarray(max_value, dtype=jnp.float32).reshape(())
    return _alpha_threshold_core(init1, max0)


class AlphaThreshold:
    """JAX/Pallas port of the PyTorch AlphaThreshold module."""

    def __init__(self, max_value: float = 1.0):
        # Matches nn.Parameter(th.zeros(1)).
        self.init = jnp.zeros((1,), dtype=jnp.float32)
        self.max_value = float(max_value)

    def __call__(self) -> jax.Array:
        return alpha_threshold_forward(self.init, self.max_value)


if __name__ == "__main__":
    # The module takes no forward inputs; its only state is the (1,) parameter.
    key = jax.random.PRNGKey(0)

    # Case 1: default deterministic init (zeros), like the PyTorch module.
    mod = AlphaThreshold(max_value=1.0)
    out_zero = jax.block_until_ready(mod())
    ref_zero = jnp.tanh(mod.init) * mod.max_value
    assert out_zero.shape == (1,)
    assert jnp.allclose(out_zero, ref_zero, atol=1e-6)

    # Case 2: random parameter value, several max_values; same compiled kernel
    # is reused (max_value is a traced scalar, not a baked-in constant).
    init_val = jax.random.normal(key, (1,), dtype=jnp.float32)
    for mv in (2.5, 0.5):
        out = jax.block_until_ready(alpha_threshold_forward(init_val, mv))
        ref = jnp.tanh(init_val) * mv
        assert out.shape == (1,)
        assert jnp.allclose(out, ref, atol=1e-6)

    # Case 3: gradient matches PushToInf's custom backward: d out / d init == -1
    # regardless of the upstream cotangent or max_value.
    g = jax.grad(lambda p: alpha_threshold_forward(p, 2.5).sum())(init_val)
    g = jax.block_until_ready(g)
    assert jnp.allclose(g, -jnp.ones_like(init_val), atol=1e-6)

    print("KERNEL_OK")
</pallas_src>

<mosaic_0001>
module attributes {stable_mosaic.version = 11 : i64} {
  func.func @_alpha_threshold_kernel(%arg0: memref<1xf32, #tpu.memory_space<smem>>, %arg1: memref<1xf32, #tpu.memory_space<smem>>, %arg2: memref<1x1xf32, #tpu.memory_space<vmem>>) attributes {dimension_semantics = [], scalar_prefetch = 0 : i64, scratch_operands = 0 : i64, tpu.core_type = #tpu.core_type<tc>} {
    %c0 = arith.constant 0 : index
    %0 = memref.load %arg0[%c0] : memref<1xf32, #tpu.memory_space<smem>>
    %1 = vector.broadcast %0 : f32 to vector<1x1xf32>
    %2 = math.tanh %1 : vector<1x1xf32>
    %c0_0 = arith.constant 0 : index
    %3 = memref.load %arg1[%c0_0] : memref<1xf32, #tpu.memory_space<smem>>
    %4 = vector.broadcast %3 : f32 to vector<1x1xf32>
    %5 = arith.mulf %2, %4 : vector<1x1xf32>
    %c0_1 = arith.constant 0 : index
    %c0_2 = arith.constant 0 : index
    %6 = vector.load %arg2[%c0_1, %c0_2] : memref<1x1xf32, #tpu.memory_space<vmem>>, vector<1x1xf32>
    tpu.vector_store %arg2[%c0_1, %c0_2], %5 {strides = array<i32>} : memref<1x1xf32, #tpu.memory_space<vmem>>, vector<1x1xf32>,
    return
  }
}

</mosaic_0001>

<bundles_post_ra>
// kernel: alpha_threshold_forward.1
= control target key start
LH: loop header
LB: loop body
LE: loop exit
PB: predicated region body
PF: predicated region fallthrough
CT: control target
= control target key end

     0   :  { %s92_s0 = inlined_call_operand.<no memory space> [shape: f32[1], index: 0, kind: input, shape index: {}]   ;;  %s93_s1 = inlined_call_operand.<no memory space> [shape: f32[1], index: 1, kind: input, shape index: {}]   ;;  %s94_s2 = inlined_call_operand.hbm [shape: f32[1,1], index: 2, kind: output, shape index: {}]  }
   0x1   :  { %v15_v0 = vstv %s92_s0 }
   0x2   :  { %9 = vsyncpa [#allocation5], 0  ;;  %39 = vtanh.f32 %v15_v0  ;;  %v18_v1 = vstv %s93_s1  ;;  %s67_s13 = smov [#allocation4]   ;;  %s29_s17 = sshll.u32 %s94_s2, 4  ;;  %vm20_vm0 = vcmask 0   ;;  %s30_s17 = int_to_ptr.hbm [resolvable:$true] %s29_s17 }
   0x3   :  { %s27_s14 = sshll.u32 %s67_s13, 4  ;;  %s28_s14 = int_to_ptr.vmem [resolvable:$true] %s27_s14 }
   0x8   :  { %v40_v2 = vpop.eup %39 }
   0x9   :  { %v19_v3 = vmul.f32 %v40_v2, %v18_v1 }
   0xb   :  { %21 = vst.msk [vmem:[#allocation4] sm:$0x1] %vm20_vm0, %v19_v3 }
   0xc   :  { %32 = dma.vmem_to_hbm [thread:$0]  %s28_s14, 16, %s30_s17, [#allocation5]  }
   0xd   :  { %65 = dma.done.wait [#allocation5], 16  }
   0xe   :  { %66 = vsyncadd [#allocation5], 4294967280 }
   0xf   :  { %37 = vsyncpa [#allocation5], 1 }

</bundles_post_ra>
